<compile_context>
chip_gen: v6e
topology: v6e:2x2x1
jax: 0.10.0
libtpu: 0.0.40
codegen_flags: <defaults>
</compile_context>

<pallas_src>
import functools
import math

import jax
import jax.numpy as jnp
from jax import lax
from jax.experimental import pallas as pl
from jax.experimental.pallas import tpu as pltpu


def _rmsnorm_kernel(x_ref, w_ref, o_ref, *, eps: float):
    # x_ref: (1, C, T) block — C on sublanes, T spatial positions on lanes.
    x = x_ref[...].astype(jnp.float32)                     # (1, C, T)
    ms = jnp.mean(x * x, axis=1, keepdims=True)            # (1, 1, T) sublane reduce
    inv = lax.rsqrt(ms + eps)                              # EUP, effectively free
    w = w_ref[...].astype(jnp.float32)[None]               # (1, C, 1)
    o_ref[...] = (x * inv * w).astype(o_ref.dtype)


def _pick_hw_tile(hw: int, c: int, itemsize: int,
                  target_bytes: int = 2 * 1024 * 1024) -> int:
    """Largest 128-aligned spatial tile targeting ~2 MiB per block."""
    t = max(128, ((target_bytes // (c * itemsize)) // 128) * 128)
    if hw <= t:
        return hw          # full spatial extent in one block (always legal)
    return t               # multiple of 128 -> legal; tail block is masked


def rmsnorm2d(x, weight, *, eps: float = 1e-5):
    """Equivalent of RMSNorm2d.forward: channel-first grid in, same shape out.

    Works for any number of trailing spatial dims (1-D / 2-D / 3-D grids),
    since only a free reshape to (B, C, prod(spatial)) is needed.
    """
    b, c = x.shape[0], x.shape[1]
    spatial = x.shape[2:]
    hw = int(math.prod(spatial))
    itemsize = jnp.dtype(x.dtype).itemsize

    xf = x.reshape(b, c, hw)            # free (contiguous) view, no transpose
    w2 = weight.reshape(c, 1)           # channels on sublanes inside the kernel

    t = _pick_hw_tile(hw, c, itemsize)
    grid = (b, pl.cdiv(hw, t))

    kernel = functools.partial(_rmsnorm_kernel, eps=eps)
    out = pl.pallas_call(
        kernel,
        out_shape=jax.ShapeDtypeStruct((b, c, hw), x.dtype),
        grid_spec=pltpu.PrefetchScalarGridSpec(
            num_scalar_prefetch=0,
            grid=grid,
            in_specs=[
                pl.BlockSpec((1, c, t), lambda i, j: (i, 0, j)),
                pl.BlockSpec((c, 1), lambda i, j: (0, 0)),   # revisited block: no re-DMA
            ],
            out_specs=pl.BlockSpec((1, c, t), lambda i, j: (i, 0, j)),
        ),
        compiler_params=pltpu.CompilerParams(
            dimension_semantics=("parallel", "parallel"),
            vmem_limit_bytes=32 * 1024 * 1024,
        ),
        cost_estimate=pl.CostEstimate(
            flops=3 * b * c * hw,
            transcendentals=b * hw,
            bytes_accessed=2 * b * c * hw * itemsize,
        ),
    )(xf, w2)

    return out.reshape(x.shape)


if __name__ == "__main__":
    key = jax.random.PRNGKey(0)
    kx, kw = jax.random.split(key)

    B, C, H, W = 2, 4, 16, 16
    x = jax.random.normal(kx, (B, C, H, W), dtype=jnp.float32)
    # nn.RMSNorm default init is weight = ones; use a non-trivial deterministic
    # weight here so the affine path is actually exercised.
    weight = 1.0 + 0.1 * jax.random.normal(kw, (C,), dtype=jnp.float32)

    eps = 1e-5
    out = rmsnorm2d(x, weight, eps=eps)
    out = jax.block_until_ready(out)

    # Pure-JAX reference (matches torch.nn.RMSNorm over the channel axis).
    ms = jnp.mean(x * x, axis=1, keepdims=True)
    ref = x / jnp.sqrt(ms + eps) * weight.reshape(1, C, 1, 1)

    assert out.shape == x.shape and out.dtype == x.dtype
    assert jnp.allclose(out, ref, atol=1e-5, rtol=1e-5)
    print("KERNEL_OK")
</pallas_src>

<mosaic_0001>
module attributes {stable_mosaic.version = 11 : i64} {
  func.func @_rmsnorm_kernel(%arg0: i32, %arg1: i32, %arg2: memref<1x4x256xf32, #tpu.memory_space<vmem>>, %arg3: memref<4x1xf32, #tpu.memory_space<vmem>>, %arg4: memref<1x4x256xf32, #tpu.memory_space<vmem>>) attributes {dimension_semantics = [#tpu.dimension_semantics<parallel>, #tpu.dimension_semantics<parallel>], iteration_bounds = array<i64: 2, 1>, scalar_prefetch = 0 : i64, scratch_operands = 0 : i64, tpu.core_type = #tpu.core_type<tc>, window_params = [{transform_indices = @transform_0, window_bounds = array<i64: 1, 4, 256>}, {pipeline_mode = #tpu.pipeline_mode<synchronous>, transform_indices = @transform_1, window_bounds = array<i64: 4, 1>}, {transform_indices = @transform_2, window_bounds = array<i64: 1, 4, 256>}]} {
    %c0 = arith.constant 0 : index
    %c0_0 = arith.constant 0 : index
    %c0_1 = arith.constant 0 : index
    %0 = vector.load %arg2[%c0, %c0_0, %c0_1] : memref<1x4x256xf32, #tpu.memory_space<vmem>>, vector<1x4x256xf32>
    %1 = arith.mulf %0, %0 : vector<1x4x256xf32>
    %cst = arith.constant dense<0.000000e+00> : vector<1x256xf32>
    %2 = vector.multi_reduction <add>, %1, %cst [1] : vector<1x4x256xf32> to vector<1x256xf32>
    %3 = vector.shape_cast %2 : vector<1x256xf32> to vector<1x1x256xf32>
    %cst_2 = arith.constant 4.000000e+00 : f32
    %4 = vector.broadcast %cst_2 : f32 to vector<1x1x256xf32>
    %5 = arith.divf %3, %4 : vector<1x1x256xf32>
    %cst_3 = arith.constant 9.99999974E-6 : f32
    %6 = vector.broadcast %cst_3 : f32 to vector<1x1x256xf32>
    %7 = arith.addf %5, %6 : vector<1x1x256xf32>
    %8 = math.rsqrt %7 : vector<1x1x256xf32>
    %c0_4 = arith.constant 0 : index
    %c0_5 = arith.constant 0 : index
    %9 = vector.load %arg3[%c0_4, %c0_5] : memref<4x1xf32, #tpu.memory_space<vmem>>, vector<4x1xf32>
    %10 = vector.shape_cast %9 : vector<4x1xf32> to vector<1x4x1xf32>
    %11 = vector.broadcast %8 : vector<1x1x256xf32> to vector<1x4x256xf32>
    %12 = arith.mulf %0, %11 : vector<1x4x256xf32>
    %13 = vector.broadcast %10 : vector<1x4x1xf32> to vector<1x4x256xf32>
    %14 = arith.mulf %12, %13 : vector<1x4x256xf32>
    %c0_6 = arith.constant 0 : index
    %c0_7 = arith.constant 0 : index
    %c0_8 = arith.constant 0 : index
    %15 = vector.load %arg4[%c0_6, %c0_7, %c0_8] : memref<1x4x256xf32, #tpu.memory_space<vmem>>, vector<1x4x256xf32>
    tpu.vector_store %arg4[%c0_6, %c0_7, %c0_8], %14 {strides = array<i32>} : memref<1x4x256xf32, #tpu.memory_space<vmem>>, vector<1x4x256xf32>,
    return
  }
  func.func @transform_0(%arg0: i32, %arg1: i32) -> (i32, i32, i32) {
    %c0_i32 = arith.constant 0 : i32
    %c0_i32_0 = arith.constant 0 : i32
    return %arg0, %c0_i32, %arg1 : i32, i32, i32
  }
  func.func @transform_1(%arg0: i32, %arg1: i32) -> (i32, i32) {
    %c0_i32 = arith.constant 0 : i32
    %c0_i32_0 = arith.constant 0 : i32
    %c0_i32_1 = arith.constant 0 : i32
    return %c0_i32, %c0_i32_0 : i32, i32
  }
  func.func @transform_2(%arg0: i32, %arg1: i32) -> (i32, i32, i32) {
    %c0_i32 = arith.constant 0 : i32
    %c0_i32_0 = arith.constant 0 : i32
    return %arg0, %c0_i32, %arg1 : i32, i32, i32
  }
}

</mosaic_0001>

<bundles_post_ra>
// kernel: tpu_custom_call.1
= control target key start
LH: loop header
LB: loop body
LE: loop exit
PB: predicated region body
PF: predicated region fallthrough
CT: control target
= control target key end

     0   :  { %7 = vsyncpa [#allocation3], 0  ;;  %s684_s0 = inlined_call_operand.hbm [shape: f32[2,4,256], index: 0, kind: input, shape index: {}]   ;;  %s685_s1 = inlined_call_operand.vmem [shape: f32[4,1], index: 1, kind: input, shape index: {}]   ;;  %s686_s2 = inlined_call_operand.hbm [shape: f32[2,4,256], index: 2, kind: output, shape index: {}]  }
   0x1   :  { %9 = vsyncpa [#allocation3 + $0x1], 0 }
   0x2   :  { %10 = vsyncpa [#allocation4], 0 }
   0x3   :  { %12 = vsyncpa [#allocation4 + $0x1], 0  ;;  %s543_s9 = smov 0   ;;  %s545_s10 = smov 0  }
   0x4   :  { %s547_s11 = smov 0   ;;  %s549_s12 = smov 0  }
   0x5   :  { %s551_s13 = smov 0   ;;  %s553_s14 = smov 0  }
   0x6 LB: > { %s328_s15 = sadd.s32 4294967295, %s522_s14   ;;  %s329_s16 = sadd.s32 4294967294, %s522_s14   ;;  %s522_s14 = sphi %s553_s14, %s18_s14   ;;  %s518_s13 = sphi %s551_s13, %s698_s13   ;;  %s514_s12 = sphi %s549_s12, %s697_s12   ;;  %s510_s11 = sphi %s547_s11, %s696_s11   ;;  %s506_s10 = sphi %s545_s10, %s695_s10   ;;  %s502_s9 = sphi %s543_s9, %s694_s9  }
   0x7   : > { %s30_s17 = sadd.s32 1, %s518_s13  ;;  %s39_s18 = sadd.s32 1, %s510_s11 }
   0x8   : > { %p32_p0 = scmp.ge.s32.totalorder %s30_s17, 2  ;;  %p46_p1 = scmp.ne.s32.totalorder %s510_s11, %s506_s10 }
   0x9   : > { %p47_p2 = scmp.eq.s32.totalorder %s522_s14, 0  ;;  %p52_p3 = scmp.ne.s32.totalorder %s506_s10, %s502_s9 }
   0xa   : > { %s700_s17 = smov (%p32_p0, %s30_s17), 0  ;;  %p53_p5 = scmp.eq.s32.totalorder %s328_s15, 0 }
   0xb   : > { %p584_p4 = por %p47_p2, %p46_p1  ;;  %s34_s20 = ssub.s32 %s518_s13, %s700_s17 }
   0xc   : > { %p99_p6 = scmp.eq.s32.totalorder %s328_s15, 1  ;;  %p37_p7 = scmp.eq.s32.totalorder %s34_s20, 0 }
   0xd   : > { %p590_p8 = por %p53_p5, %p52_p3  ;;  %p105_p10 = scmp.eq.s32.totalorder %s329_s16, 1 }
   0xe   : > { %p594_p9 = por %p99_p6, %p46_p1  ;;  %p357_p13 = scmp.lt.s32.totalorder %s522_s14, 2 }
   0xf   : > { %s599_s23 = scalar_select %p37_p7, %s510_s11, %s39_s18  }
  0x10   : > { %p601_p11 = por %p105_p10, %p52_p3  ;;  %s128_s25 = sand.u32 1, %s510_s11  }
  0x11   : > { %s332_s26 = sshll.u32 %s128_s25, 3  ;;  %s343_s27 = sshll.u32 %s518_s13, 7 }
  0x12   : > { %s690_s24 = scalar_select %p601_p11, 1, 0 }
  0x13   : > { %s140_s30 = scalar_lea.hbm %s684_s0, %s343_s27  ;;  %s132_s3 = scalar_lea.vmem [#allocation2], %s332_s26 }
  0x14   : > { %s142_s4 = sshll.u32 %s132_s3, 4  ;;  %p614_p0 = pnand %p357_p13, %p584_p4  ;;  %s143_s4 = int_to_ptr.vmem [resolvable:$true] %s142_s4 }
  0x15   : > { %p335_p1 = scmp.ge.s32.totalorder %s522_s14, 1  ;;  %p147_p2 = scmp.lt.s32.totalorder %s522_s14, 3 }
  0x16   : > { %s129_s6 = scalar_lea.sflag [#allocation3], %s128_s25  ;;  %p416_p3 = pneg %p614_p0 }
  0x17   : > { %s427_s7 = scalar_lea.vmem %s143_s4, 128  ;;  %s524_s8 = smov [#allocation2]  }
  0x18   : > { %p428_p5 = scmp.ne.s32.totalorder %s143_s4, %s427_s7  ;;  %s432_s15 = sshll.u32 %s524_s8, 4  ;;  %s433_s15 = int_to_ptr.vmem [resolvable:$false] %s432_s15 }
  0x19   : > { %s434_s16 = scalar_lea.vmem %s433_s15, 256  ;;  %p435_p10 = scmp.lt.s32.totalorder %s143_s4, %s433_s15 }
  0x1a   : > { %p430_p6 = pnand %p428_p5, %p416_p3  ;;  %p436_p12 = scmp.lt.s32.totalorder %s434_s16, %s427_s7 }
  0x1c   : > { %p431_p7 = pneg %p430_p6  ;;  %p437_p4 = por %p436_p12, %p435_p10 }
  0x1e   : > { %p438_p13 = pnand %p437_p4, %p431_p7 }
  0x20   : > { %441 = shalt.err (!%p438_p13)
}
  0x21   : > { %352 = dma.hbm_to_vmem [thread:$0]  (!%p614_p0), %s140_s30, 128, %s143_s4, %s129_s6  }
  0x22   : > { %p148_p11 = pnand %p335_p1, %p147_p2 }
  0x23   : > { %s629_s18 = sand.u32 (!%p148_p11), 1, %s506_s10  }
  0x24   : > { %151 = sbr.rel (%p148_p11) target bundleno = 185 (0xb9), region = 28  ;;  %s336_s19 = sshll.u32 (!%p148_p11), %s629_s18, 3 }
  0x25   : > { %s154_s20 = scalar_lea.sflag (!%p148_p11), [#allocation3], %s629_s18  ;;  %s157_s25 = scalar_lea.vmem (!%p148_p11), [#allocation2], %s336_s19 }
  0x29   : > { %493 = dma.done.wait (%p590_p8), %s154_s20, 128  }
  0x2a   : > { %495 = vsyncadd (%p590_p8), %s154_s20, 4294967168  ;;  %v525_v0 = vmov 0   ;;  %v207_v1 = vld [vmem:[%s685_s1] sm:$0xf]  ;;  %vm185_vm0 = vcmask 1043456   ;;  %v220_v25 = vlaneseq  ;;  %s344_s21 = sshll.u32 %s514_s12, 7 }
  0x2b   : > { %409 = vset.pattern.permute.xlu0 %v525_v0  ;;  %v180_v2 = vld [vmem:[%s157_s25] sm:$0xff]  ;;  %v526_v23 = vmov 839922192   ;;  %s177_s28 = scalar_lea.vmem [#allocation5], %s336_s19  ;;  %s242_s4 = scalar_lea.hbm %s686_s2, %s344_s21 }
  0x2c   : > { %215 = vperm.xlu0 %409, %v207_v1   ;;  %v181_v3 = vmul.f32 %v180_v2, %v180_v2  ;;  %v218_v24 = vunpack.c.l.s4 %v526_v23  ;;  %v221_v29 = vshrl.u32 %v220_v25, 7  ;;  %s244_s29 = sshll.u32 %s177_s28, 4  ;;  %s228_s5 = scalar_lea.sflag [#allocation4], %s629_s18  ;;  %s245_s29 = int_to_ptr.vmem [resolvable:$true] %s244_s29 }
  0x2d   : > { %s442_s6 = scalar_lea.vmem %s245_s29, 128  ;;  %s527_s7 = smov [#allocation5]  }
  0x2e   : > { %v183_v4 = vcombine.high %v181_v3, %v181_v3  ;;  %v186_v5 = vsel %vm185_vm0, %v181_v3, 0.0  ;;  %v219_v28 = vunpack.c.0.s8 %v218_v24  ;;  %p443_p8 = scmp.ne.s32.totalorder %s245_s29, %s442_s6  ;;  %s446_s8 = sshll.u32 %s527_s7, 4  ;;  %s447_s8 = int_to_ptr.vmem [resolvable:$false] %s446_s8 }
  0x2f   : > { %v187_v7 = vrot.slane %v186_v5, 4  ;;  %s448_s12 = scalar_lea.vmem %s447_s8, 256  ;;  %p449_p0 = scmp.lt.s32.totalorder %s245_s29, %s447_s8 }
  0x30   : > { %v193_v6 = vsel %vm185_vm0, %v183_v4, 0.0  ;;  %v222_v31 = vsub.s32 %v219_v28, %v221_v29  ;;  %p444_p11 = pnand %p443_p8, %p594_p9  ;;  %p450_p1 = scmp.lt.s32.totalorder %s448_s12, %s442_s6 }
  0x31   : > { %v194_v8 = vrot.slane %v193_v6, 4  ;;  %v188_v9 = vadd.f32 %v187_v7, %v186_v5 }
  0x32   : > { %p445_p12 = pneg %p444_p11  ;;  %p451_p2 = por %p450_p1, %p449_p0 }
  0x33   : > { %v195_v10 = vadd.f32 %v194_v8, %v193_v6  ;;  %v189_v11 = vrot.slane %v188_v9, 2 }
  0x34   : > { %p452_p3 = pnand %p451_p2, %p445_p12 }
  0x35   : > { %v196_v12 = vrot.slane %v195_v10, 2  ;;  %v190_v13 = vadd.f32 %v189_v11, %v188_v9 }
  0x37   : > { %v197_v14 = vadd.f32 %v196_v12, %v195_v10  ;;  %v191_v15 = vrot.slane %v190_v13, 1 }
  0x39   : > { %v198_v16 = vrot.slane %v197_v14, 1  ;;  %v192_v17 = vadd.f32 %v191_v15, %v190_v13 }
  0x3b   : > { %v199_v18 = vadd.f32 %v198_v16, %v197_v14  ;;  %v201_v19 = vmul.f32 0.25, %v192_v17 }
  0x3d   : > { %v202_v20 = vmul.f32 0.25, %v199_v18  ;;  %v203_v21 = vadd.f32 1e-05, %v201_v19 }
  0x3f   : > { %v204_v22 = vadd.f32 1e-05, %v202_v20  ;;  %410 = vrsqrt.f32 %v203_v21 }
  0x41   : > { %412 = vrsqrt.f32 %v204_v22 }
  0x4c   : > { %v411_v26 = vpop.eup %410 }
  0x4e   : > { %v413_v27 = vpop.eup %412 }
  0x4f   : > { %v210_v30 = vcombine.low %v411_v26, %v413_v27 }
  0x51   : > { %v212_v32 = vmul.f32 %v210_v30, %v180_v2 }
  0xa7   : > { %v216_v33 = vpop.permute.xlu0 %215 }
  0xa8   : > { %v223_v34 = vrot.slane %v216_v33, %v222_v31 }
  0xaa   : > { %v225_v35 = vmul.f32 %v223_v34, %v212_v32 }
  0xac   : > { %226 = vst [vmem:[%s177_s28] sm:$0xff] %v225_v35 }
  0xad   : > { %455 = shalt.err (!%p452_p3)
}
  0xae   : > { %s456_s15 = scalar_lea.hbm %s242_s4, 128  ;;  %s460_s19 = scalar_lea.hbm %s686_s2, 256 }
  0xaf   : > { %p457_p5 = scmp.ne.s32.totalorder %s242_s4, %s456_s15  ;;  %p461_p10 = scmp.lt.s32.totalorder %s242_s4, %s686_s2 }
  0xb0   : > { %p462_p4 = scmp.lt.s32.totalorder %s460_s19, %s456_s15 }
  0xb1   : > { %p458_p6 = pnand %p457_p5, %p594_p9 }
  0xb2   : > { %p463_p13 = por %p462_p4, %p461_p10 }
  0xb3   : > { %p459_p7 = pneg %p458_p6 }
  0xb5   : > { %p464_p8 = pnand %p463_p13, %p459_p7 }
  0xb7   : > { %467 = shalt.err (!%p464_p8)
}
  0xb8   : > { %347 = dma.vmem_to_hbm [thread:$0]  (%p594_p9), %s245_s29, 128, %s242_s4, %s228_s5  }
  0xb9 PF: > { %s256_s26 = sand.u32 1, %s502_s9   ;;  %p692_p11 = scmp.ne.s32.totalorder %s690_s24, 0 }
  0xba   : > { %p693_p12 = scmp.ge.s32.totalorder %s522_s14, 2  ;;  %s257_s27 = scalar_lea.sflag [#allocation4], %s256_s26 }
  0xbc   : > { %p354_p0 = pnand %p693_p12, %p692_p11 }
  0xbe   : > { %p355_p1 = pneg %p354_p0 }
  0xc0   : > { %497 = dma.done.wait (%p355_p1), %s257_s27, 128  }
  0xc1   : > { %499 = vsyncadd (%p355_p1), %s257_s27, 4294967168  ;;  %s18_s14 = sadd.s32 1, %s522_s14   ;;  %s694_s9 = smov %s506_s10 }
  0xc2   : > { %p15_p2 = scmp.ge.s32.totalorder %s18_s14, 4   ;;  %s695_s10 = smov %s510_s11 }
  0xc3   : > { %s696_s11 = smov %s599_s23  ;;  %s697_s12 = smov %s518_s13 }
  0xc4   : > { %s698_s13 = smov %s700_s17  ;;  %17 = sbr.rel (!%p15_p2) target bundleno = 6 (0x6), region = 73 }
  0xc9   :  { %262 = vsyncpa [#allocation3], 1 }
  0xca   :  { %264 = vsyncpa [#allocation3 + $0x1], 1 }
  0xcb   :  { %265 = vsyncpa [#allocation4], 1 }
  0xcc   :  { %267 = vsyncpa [#allocation4 + $0x1], 1 }

</bundles_post_ra>
